<compile_context>
chip_gen: v7x
topology: tpu7x:2x2x1
jax: 0.10.0
libtpu: 0.0.40
codegen_flags: <defaults>
</compile_context>

<pallas_src>
import functools

import numpy as np

import jax
import jax.numpy as jnp
from jax.experimental import pallas as pl
from jax.experimental.pallas import tpu as pltpu

EPSILON = 1e-10
LANE = 128


def _focal_kernel(x_ref, t_ref, *out_refs, gamma, smooth_lo, smooth_hi,
                  alphas, p_total, need_mask, need_alpha):
    # x_ref : (1, C, TS, 128) logits tile (native dtype)
    # t_ref : (1, TS, 128)    int32 class ids
    # outs  : (1, 1, 1, 128)  f32 per-(n, s) lane-dense partial sums
    if need_alpha:
        focal_out_ref, alpha_out_ref = out_refs
    else:
        (focal_out_ref,) = out_refs

    _, C, TS, L = x_ref.shape

    tgt = t_ref[0]                                            # (TS, L) int32
    if need_mask:
        s_idx = pl.program_id(1)
        row = jax.lax.broadcasted_iota(jnp.int32, (TS, L), 0)
        lane = jax.lax.broadcasted_iota(jnp.int32, (TS, L), 1)
        pix = (s_idx * TS + row) * L + lane                   # flat pixel idx
        valid = pix < p_total
        # out-of-range pixels: class -1 -> matches no class -> contributes 0
        tgt = jnp.where(valid, tgt, -1)

    # ---- running max over classes in the NATIVE dtype (C is a leading dim,
    #      so this is pure elementwise VPU work, no cross-lane XLU) ----------
    # TODO(synk): for num_class in the tens/hundreds, replace these static
    # Python unrolls with a lax.fori_loop over c (dynamic leading index) or a
    # class grid axis; full unrolling blows up code size / temporaries there.
    m_nat = x_ref[0, 0]
    for c in range(1, C):
        m_nat = jnp.maximum(m_nat, x_ref[0, c])
    m = m_nat.astype(jnp.float32)

    z = jnp.zeros((TS, L), jnp.float32)        # softmax denominator
    e_t = jnp.zeros((TS, L), jnp.float32)      # exp(x[target] - m) via selects
    if need_alpha:
        a_row = jnp.zeros((TS, L), jnp.float32)
    for c in range(C):
        e_c = jnp.exp(x_ref[0, c].astype(jnp.float32) - m)
        z = z + e_c
        hit = tgt == c
        e_t = jnp.where(hit, e_c, e_t)
        if need_alpha:
            a_row = jnp.where(hit, jnp.float32(float(alphas[c])), a_row)

    soft_t = e_t / z                                          # softmax[target]
    if smooth_lo != 0.0 or smooth_hi != 1.0:
        # label smoothing folds into two static scalars:
        #   pt = sum_c clip(onehot_c, s, 1-s) * softmax_c
        #      = lo * (1 - softmax_tgt) + hi * softmax_tgt
        pt = smooth_lo + (smooth_hi - smooth_lo) * soft_t + EPSILON
    else:
        pt = soft_t + EPSILON
    logpt = jnp.log(pt)

    if float(gamma).is_integer() and 0 <= int(gamma) <= 16:
        # integer gamma (default 2): repeated multiplies -- VPU only, no pow.
        one_minus = 1.0 - pt
        powv = jnp.ones_like(pt)
        for _ in range(int(gamma)):
            powv = powv * one_minus
    else:
        # TODO(synk): torch.pow(slightly-negative, non-integer) would be NaN;
        # we clamp the base at 0 instead (documented deviation).
        powv = jnp.power(jnp.maximum(1.0 - pt, 0.0), float(gamma))
    focal = -powv * logpt                                     # (TS, L)

    if need_mask:
        focal = jnp.where(valid, focal, 0.0)   # a_row is already 0 there

    # one sublane (XLU) reduce per step; lane-dense (1,1,1,128) stores
    focal_out_ref[...] = jnp.sum(
        focal, axis=0, keepdims=True).reshape(1, 1, 1, L)
    if need_alpha:
        alpha_out_ref[...] = jnp.sum(
            a_row, axis=0, keepdims=True).reshape(1, 1, 1, L)


def focal_loss_pallas(x, target, *, num_class, alpha=None, gamma=2.0,
                      balance_index=-1, smooth=None, size_average=True,
                      tile_bytes=4 << 20):
    """x: (N, C, H, W) logits (any float dtype); target: (N, H, W) class ids."""
    # --- alpha setup, mirroring Focal_loss.__init__ (static Python values) ---
    if alpha is None:
        alpha_vec = np.ones((num_class,), np.float32)
    elif isinstance(alpha, (list, tuple, np.ndarray)):
        a = np.asarray(alpha, np.float32)
        assert a.shape[0] == num_class
        alpha_vec = a / a.sum()
    elif isinstance(alpha, float):
        alpha_vec = np.full((num_class,), 1.0 - alpha, np.float32)
        alpha_vec[balance_index] = alpha
    else:
        raise TypeError("Not support alpha type")
    if smooth is not None and (smooth < 0 or smooth > 1.0):
        raise ValueError("smooth value should be in [0,1]")
    alphas = tuple(float(v) for v in alpha_vec)
    need_alpha = any(v != alphas[0] for v in alphas)

    if smooth:  # PyTorch uses a truthy check ("if self.smooth:")
        smooth_lo = float(np.clip(0.0, smooth, 1.0 - smooth))
        smooth_hi = float(np.clip(1.0, smooth, 1.0 - smooth))
    else:
        smooth_lo, smooth_hi = 0.0, 1.0

    N, C, H, W = x.shape
    assert C == num_class
    P = H * W

    # --- lane-dense spatial layout: (N,C,H,W) -> (N,C,S,128); free reshape,
    #     one pad pass only when H*W is not a multiple of 128 ----------------
    S = int(pl.cdiv(P, LANE))
    p_pad = S * LANE
    x_r = x.reshape(N, C, P)
    # Target stays int32: narrowing only pays when a cast pass already exists,
    # and sub-32-bit targets would impose their own (16/32-row) sublane tiling.
    t_r = target.astype(jnp.int32).reshape(N, P)
    if p_pad != P:
        x_r = jnp.pad(x_r, ((0, 0), (0, 0), (0, p_pad - P)))
        t_r = jnp.pad(t_r, ((0, 0), (0, p_pad - P)), constant_values=-1)
    x_r = x_r.reshape(N, C, S, LANE)
    t_r = t_r.reshape(N, S, LANE)

    # --- tile selection: ~tile_bytes logits tile, TS a multiple of the
    #     dtype's sublane packing (8 f32 / 16 bf16 / 32 int8) or TS == S -----
    itemsize = jnp.dtype(x.dtype).itemsize
    pack = max(8, 32 // max(itemsize, 1))
    row_bytes = max(C * LANE * itemsize, 1)
    ts = max(1, int(tile_bytes) // row_bytes)
    if ts >= S:
        ts = S
    else:
        ts = max(pack, (ts // pack) * pack)
        if ts >= S:
            ts = S
    ts = int(ts)

    # --- per-generation VMEM budget ------------------------------------------
    def _vmem_need(ts_):
        x_tile = C * ts_ * LANE * itemsize
        t_tile = ts_ * LANE * 4
        f32_tmp = 12 * ts_ * LANE * 4         # body temporaries (m, z, e_*, ...)
        return 2 * (x_tile + t_tile) + f32_tmp + (2 << 20)

    try:
        phys_vmem = int(pltpu.get_tpu_info().vmem_capacity_bytes)
    except Exception:                          # no TPU / interpret / old API
        phys_vmem = 64 << 20                   # v7x-safe fallback
    cap = (phys_vmem * 3) // 4                 # ~48 MiB v7x, ~96 MiB v5e/v6e

    min_ts = S if S <= pack else pack
    while ts > min_ts and _vmem_need(ts) > cap:
        ts = max(min_ts, ((ts // 2) // pack) * pack)
    # TODO(synk): if even the minimal (pack-row) tile exceeds `cap` for huge
    # num_class, class tiling on a third grid axis is required; not implemented.
    vmem_limit = int(min(max(_vmem_need(ts), 32 << 20), cap))

    sb = int(pl.cdiv(S, ts))
    need_mask = (sb * ts * LANE) != P

    kernel = functools.partial(
        _focal_kernel, gamma=float(gamma), smooth_lo=smooth_lo,
        smooth_hi=smooth_hi, alphas=alphas, p_total=P,
        need_mask=need_mask, need_alpha=need_alpha)

    out_shapes = [jax.ShapeDtypeStruct((N, sb, 1, LANE), jnp.float32)]
    out_specs = [pl.BlockSpec((1, 1, 1, LANE), lambda n, s: (n, s, 0, 0))]
    if need_alpha:
        out_shapes.append(jax.ShapeDtypeStruct((N, sb, 1, LANE), jnp.float32))
        out_specs.append(
            pl.BlockSpec((1, 1, 1, LANE), lambda n, s: (n, s, 0, 0)))

    results = pl.pallas_call(
        kernel,
        out_shape=tuple(out_shapes),
        grid_spec=pltpu.PrefetchScalarGridSpec(
            num_scalar_prefetch=0,
            grid=(N, sb),
            in_specs=[
                pl.BlockSpec((1, C, ts, LANE), lambda n, s: (n, 0, s, 0)),
                pl.BlockSpec((1, ts, LANE), lambda n, s: (n, s, 0)),
            ],
            out_specs=tuple(out_specs),
        ),
        compiler_params=pltpu.CompilerParams(
            dimension_semantics=("parallel", "parallel"),
            vmem_limit_bytes=vmem_limit),
    )(x_r, t_r)

    m_rows = N * H * W
    focal_sum = jnp.sum(results[0])
    if need_alpha:
        alpha_sum = jnp.sum(results[1])
    else:
        alpha_sum = jnp.float32(alphas[0] * m_rows)
    if size_average:
        # mean over the implicit (M, 1, M) broadcast loss tensor
        return (alpha_sum / m_rows) * (focal_sum / m_rows)
    return alpha_sum * focal_sum


def focal_loss_ref(x, target, *, num_class, gamma=2.0, smooth=None,
                   size_average=True):
    """Pure-JAX reference matching the PyTorch forward (incl. broadcasting)."""
    logit = jax.nn.softmax(x, axis=1)
    N, C, H, W = x.shape
    logit = jnp.transpose(logit, (0, 2, 3, 1)).reshape(-1, C)
    t = target.reshape(-1)
    one_hot = jax.nn.one_hot(t, num_class, dtype=jnp.float32)
    if smooth is not None:
        one_hot = jnp.clip(one_hot, smooth, 1.0 - smooth)
    pt = (one_hot * logit).sum(1) + EPSILON
    logpt = jnp.log(pt)
    alpha_vec = jnp.ones((num_class,), jnp.float32)
    alpha = alpha_vec[t][:, None, None]                 # (M,1,1)
    loss = -1.0 * alpha * (1.0 - pt) ** gamma * logpt   # (M,1,M) broadcast
    return loss.mean() if size_average else loss.sum()


if __name__ == "__main__":
    key = jax.random.PRNGKey(0)
    k1, k2 = jax.random.split(key)
    N, C, H, W = 2, 4, 16, 16
    x = jax.random.normal(k1, (N, C, H, W), dtype=jnp.float32)
    target = jax.random.randint(k2, (N, H, W), 0, C, dtype=jnp.int32)

    loss = focal_loss_pallas(x, target, num_class=C)
    loss = jax.block_until_ready(loss)

    ref = focal_loss_ref(x, target, num_class=C)
    assert jnp.allclose(loss, ref, rtol=1e-4, atol=1e-6), (loss, ref)
    print("KERNEL_OK")
</pallas_src>

<mosaic_0001>
module attributes {stable_mosaic.version = 11 : i64} {
  func.func @_focal_kernel(%arg0: i32, %arg1: i32, %arg2: memref<1x4x2x128xf32, #tpu.memory_space<vmem>>, %arg3: memref<1x2x128xi32, #tpu.memory_space<vmem>>, %arg4: memref<1x1x1x128xf32, #tpu.memory_space<vmem>>) attributes {dimension_semantics = [#tpu.dimension_semantics<parallel>, #tpu.dimension_semantics<parallel>], iteration_bounds = array<i64: 2, 1>, scalar_prefetch = 0 : i64, scratch_operands = 0 : i64, tpu.core_type = #tpu.core_type<tc>, window_params = [{transform_indices = @transform_0, window_bounds = array<i64: 1, 4, 2, 128>}, {transform_indices = @transform_1, window_bounds = array<i64: 1, 2, 128>}, {transform_indices = @transform_2, window_bounds = array<i64: 1, 1, 1, 128>}]} {
    %c0 = arith.constant 0 : index
    %c0_0 = arith.constant 0 : index
    %c0_1 = arith.constant 0 : index
    %0 = vector.load %arg3[%c0, %c0_0, %c0_1] : memref<1x2x128xi32, #tpu.memory_space<vmem>>, vector<1x2x128xi32>
    %1 = vector.shape_cast %0 : vector<1x2x128xi32> to vector<2x128xi32>
    %c0_2 = arith.constant 0 : index
    %c0_3 = arith.constant 0 : index
    %c0_4 = arith.constant 0 : index
    %c0_5 = arith.constant 0 : index
    %2 = vector.load %arg2[%c0_2, %c0_3, %c0_4, %c0_5] : memref<1x4x2x128xf32, #tpu.memory_space<vmem>>, vector<1x1x2x128xf32>
    %3 = vector.shape_cast %2 : vector<1x1x2x128xf32> to vector<2x128xf32>
    %c0_6 = arith.constant 0 : index
    %c1 = arith.constant 1 : index
    %c0_7 = arith.constant 0 : index
    %c0_8 = arith.constant 0 : index
    %4 = vector.load %arg2[%c0_6, %c1, %c0_7, %c0_8] : memref<1x4x2x128xf32, #tpu.memory_space<vmem>>, vector<1x1x2x128xf32>
    %5 = vector.shape_cast %4 : vector<1x1x2x128xf32> to vector<2x128xf32>
    %6 = arith.maximumf %3, %5 : vector<2x128xf32>
    %c0_9 = arith.constant 0 : index
    %c2 = arith.constant 2 : index
    %c0_10 = arith.constant 0 : index
    %c0_11 = arith.constant 0 : index
    %7 = vector.load %arg2[%c0_9, %c2, %c0_10, %c0_11] : memref<1x4x2x128xf32, #tpu.memory_space<vmem>>, vector<1x1x2x128xf32>
    %8 = vector.shape_cast %7 : vector<1x1x2x128xf32> to vector<2x128xf32>
    %9 = arith.maximumf %6, %8 : vector<2x128xf32>
    %c0_12 = arith.constant 0 : index
    %c3 = arith.constant 3 : index
    %c0_13 = arith.constant 0 : index
    %c0_14 = arith.constant 0 : index
    %10 = vector.load %arg2[%c0_12, %c3, %c0_13, %c0_14] : memref<1x4x2x128xf32, #tpu.memory_space<vmem>>, vector<1x1x2x128xf32>
    %11 = vector.shape_cast %10 : vector<1x1x2x128xf32> to vector<2x128xf32>
    %12 = arith.maximumf %9, %11 : vector<2x128xf32>
    %cst = arith.constant 0.000000e+00 : f32
    %13 = vector.broadcast %cst : f32 to vector<2x128xf32>
    %cst_15 = arith.constant 0.000000e+00 : f32
    %14 = vector.broadcast %cst_15 : f32 to vector<2x128xf32>
    %c0_16 = arith.constant 0 : index
    %c0_17 = arith.constant 0 : index
    %c0_18 = arith.constant 0 : index
    %c0_19 = arith.constant 0 : index
    %15 = vector.load %arg2[%c0_16, %c0_17, %c0_18, %c0_19] : memref<1x4x2x128xf32, #tpu.memory_space<vmem>>, vector<1x1x2x128xf32>
    %16 = vector.shape_cast %15 : vector<1x1x2x128xf32> to vector<2x128xf32>
    %17 = arith.subf %16, %12 : vector<2x128xf32>
    %18 = math.exp %17 : vector<2x128xf32>
    %19 = arith.addf %13, %18 : vector<2x128xf32>
    %c0_i32 = arith.constant 0 : i32
    %20 = vector.broadcast %c0_i32 : i32 to vector<2x128xi32>
    %21 = arith.cmpi eq, %1, %20 : vector<2x128xi32>
    %22 = arith.select %21, %18, %14 : vector<2x128xi1>, vector<2x128xf32>
    %c0_20 = arith.constant 0 : index
    %c1_21 = arith.constant 1 : index
    %c0_22 = arith.constant 0 : index
    %c0_23 = arith.constant 0 : index
    %23 = vector.load %arg2[%c0_20, %c1_21, %c0_22, %c0_23] : memref<1x4x2x128xf32, #tpu.memory_space<vmem>>, vector<1x1x2x128xf32>
    %24 = vector.shape_cast %23 : vector<1x1x2x128xf32> to vector<2x128xf32>
    %25 = arith.subf %24, %12 : vector<2x128xf32>
    %26 = math.exp %25 : vector<2x128xf32>
    %27 = arith.addf %19, %26 : vector<2x128xf32>
    %c1_i32 = arith.constant 1 : i32
    %28 = vector.broadcast %c1_i32 : i32 to vector<2x128xi32>
    %29 = arith.cmpi eq, %1, %28 : vector<2x128xi32>
    %30 = arith.select %29, %26, %22 : vector<2x128xi1>, vector<2x128xf32>
    %c0_24 = arith.constant 0 : index
    %c2_25 = arith.constant 2 : index
    %c0_26 = arith.constant 0 : index
    %c0_27 = arith.constant 0 : index
    %31 = vector.load %arg2[%c0_24, %c2_25, %c0_26, %c0_27] : memref<1x4x2x128xf32, #tpu.memory_space<vmem>>, vector<1x1x2x128xf32>
    %32 = vector.shape_cast %31 : vector<1x1x2x128xf32> to vector<2x128xf32>
    %33 = arith.subf %32, %12 : vector<2x128xf32>
    %34 = math.exp %33 : vector<2x128xf32>
    %35 = arith.addf %27, %34 : vector<2x128xf32>
    %c2_i32 = arith.constant 2 : i32
    %36 = vector.broadcast %c2_i32 : i32 to vector<2x128xi32>
    %37 = arith.cmpi eq, %1, %36 : vector<2x128xi32>
    %38 = arith.select %37, %34, %30 : vector<2x128xi1>, vector<2x128xf32>
    %c0_28 = arith.constant 0 : index
    %c3_29 = arith.constant 3 : index
    %c0_30 = arith.constant 0 : index
    %c0_31 = arith.constant 0 : index
    %39 = vector.load %arg2[%c0_28, %c3_29, %c0_30, %c0_31] : memref<1x4x2x128xf32, #tpu.memory_space<vmem>>, vector<1x1x2x128xf32>
    %40 = vector.shape_cast %39 : vector<1x1x2x128xf32> to vector<2x128xf32>
    %41 = arith.subf %40, %12 : vector<2x128xf32>
    %42 = math.exp %41 : vector<2x128xf32>
    %43 = arith.addf %35, %42 : vector<2x128xf32>
    %c3_i32 = arith.constant 3 : i32
    %44 = vector.broadcast %c3_i32 : i32 to vector<2x128xi32>
    %45 = arith.cmpi eq, %1, %44 : vector<2x128xi32>
    %46 = arith.select %45, %42, %38 : vector<2x128xi1>, vector<2x128xf32>
    %47 = arith.divf %46, %43 : vector<2x128xf32>
    %cst_32 = arith.constant 1.000000e-10 : f32
    %48 = vector.broadcast %cst_32 : f32 to vector<2x128xf32>
    %49 = arith.addf %47, %48 : vector<2x128xf32>
    %50 = math.log %49 : vector<2x128xf32>
    %cst_33 = arith.constant 1.000000e+00 : f32
    %51 = vector.broadcast %cst_33 : f32 to vector<2x128xf32>
    %52 = arith.subf %51, %49 : vector<2x128xf32>
    %cst_34 = arith.constant 1.000000e+00 : f32
    %53 = vector.broadcast %cst_34 : f32 to vector<2x128xf32>
    %54 = arith.mulf %53, %52 : vector<2x128xf32>
    %55 = arith.mulf %54, %52 : vector<2x128xf32>
    %cst_35 = arith.constant 0.000000e+00 : f32
    %56 = vector.broadcast %cst_35 : f32 to vector<2x128xf32>
    %57 = arith.subf %56, %55 : vector<2x128xf32>
    %58 = arith.mulf %57, %50 : vector<2x128xf32>
    %cst_36 = arith.constant dense<0.000000e+00> : vector<128xf32>
    %59 = vector.multi_reduction <add>, %58, %cst_36 [0] : vector<2x128xf32> to vector<128xf32>
    %60 = vector.shape_cast %59 : vector<128xf32> to vector<1x128xf32>
    %61 = vector.shape_cast %60 : vector<1x128xf32> to vector<1x1x1x128xf32>
    %c0_37 = arith.constant 0 : index
    %c0_38 = arith.constant 0 : index
    %c0_39 = arith.constant 0 : index
    %c0_40 = arith.constant 0 : index
    %62 = vector.load %arg4[%c0_37, %c0_38, %c0_39, %c0_40] : memref<1x1x1x128xf32, #tpu.memory_space<vmem>>, vector<1x1x1x128xf32>
    tpu.vector_store %arg4[%c0_37, %c0_38, %c0_39, %c0_40], %61 {strides = array<i32>} : memref<1x1x1x128xf32, #tpu.memory_space<vmem>>, vector<1x1x1x128xf32>,
    return
  }
  func.func @transform_0(%arg0: i32, %arg1: i32) -> (i32, i32, i32, i32) {
    %c0_i32 = arith.constant 0 : i32
    %c0_i32_0 = arith.constant 0 : i32
    %c0_i32_1 = arith.constant 0 : i32
    return %arg0, %c0_i32, %arg1, %c0_i32_0 : i32, i32, i32, i32
  }
  func.func @transform_1(%arg0: i32, %arg1: i32) -> (i32, i32, i32) {
    %c0_i32 = arith.constant 0 : i32
    %c0_i32_0 = arith.constant 0 : i32
    return %arg0, %arg1, %c0_i32 : i32, i32, i32
  }
  func.func @transform_2(%arg0: i32, %arg1: i32) -> (i32, i32, i32, i32) {
    %c0_i32 = arith.constant 0 : i32
    %c0_i32_0 = arith.constant 0 : i32
    %c0_i32_1 = arith.constant 0 : i32
    return %arg0, %arg1, %c0_i32, %c0_i32_0 : i32, i32, i32, i32
  }
}

</mosaic_0001>

<bundles_post_ra>
// kernel: tpu_custom_call.1
= control target key start
LH: loop header
LB: loop body
LE: loop exit
PB: predicated region body
PF: predicated region fallthrough
CT: control target
= control target key end

     0   :  { %7 = vsyncpa [#allocation3], 0  ;;  %s870_s0 = inlined_call_operand.hbm [shape: f32[2,4,2,128], index: 0, kind: input, shape index: {}]   ;;  %s871_s1 = inlined_call_operand.hbm [shape: s32[2,2,128], index: 1, kind: input, shape index: {}]   ;;  %s872_s2 = inlined_call_operand.hbm [shape: f32[2,1,1,128], index: 2, kind: output, shape index: {}]  }
   0x1   :  { %9 = vsyncpa [#allocation3 + $0x1], 0 }
   0x2   :  { %10 = vsyncpa [#allocation6], 0 }
   0x3   :  { %12 = vsyncpa [#allocation6 + $0x1], 0 }
   0x4   :  { %13 = vsyncpa [#allocation4], 0 }
   0x5   :  { %15 = vsyncpa [#allocation4 + $0x1], 0  ;;  %s654_s9 = smov 0   ;;  %s656_s10 = smov 0  }
   0x6   :  { %s658_s11 = smov 0   ;;  %s660_s12 = smov 0  }
   0x7   :  { %s662_s13 = smov 0   ;;  %s664_s14 = smov 0  }
   0x8 LB: > { %s386_s15 = sadd.s32 4294967295, %s632_s14   ;;  %s387_s16 = sadd.s32 4294967294, %s632_s14   ;;  %s632_s14 = sphi %s664_s14, %s21_s14   ;;  %s628_s13 = sphi %s662_s13, %s891_s13   ;;  %s624_s12 = sphi %s660_s12, %s890_s12   ;;  %s620_s11 = sphi %s658_s11, %s889_s11   ;;  %s616_s10 = sphi %s656_s10, %s888_s10   ;;  %s612_s9 = sphi %s654_s9, %s887_s9  }
   0x9   : > { %s33_s17 = sadd.s32 1, %s628_s13  ;;  %s42_s18 = sadd.s32 1, %s620_s11 }
   0xa   : > { %p35_p0 = scmp.ge.s32.totalorder %s33_s17, 2  ;;  %p49_p1 = scmp.ne.s32.totalorder %s620_s11, %s616_s10 }
   0xb   : > { %p50_p2 = scmp.eq.s32.totalorder %s632_s14, 0  ;;  %p55_p3 = scmp.ne.s32.totalorder %s616_s10, %s612_s9 }
   0xc   : > { %s893_s17 = smov (%p35_p0, %s33_s17), 0  ;;  %p56_p5 = scmp.eq.s32.totalorder %s386_s15, 0 }
   0xd   : > { %p695_p4 = por %p50_p2, %p49_p1  ;;  %s37_s20 = ssub.s32 %s628_s13, %s893_s17 }
   0xe   : > { %p109_p6 = scmp.eq.s32.totalorder %s386_s15, 1  ;;  %p40_p7 = scmp.eq.s32.totalorder %s37_s20, 0 }
   0xf   : > { %p701_p8 = por %p56_p5, %p55_p3  ;;  %p115_p10 = scmp.eq.s32.totalorder %s387_s16, 1 }
  0x10   : > { %p705_p9 = por %p109_p6, %p49_p1  ;;  %p422_p13 = scmp.lt.s32.totalorder %s632_s14, 2 }
  0x11   : > { %s876_s21 = scalar_select %p701_p8, 1, 0 }
  0x12   : > { %s877_s22 = scalar_select %p705_p9, 1, 0 }
  0x13   : > { %s710_s23 = scalar_select %p40_p7, %s620_s11, %s42_s18  }
  0x14   : > { %p712_p11 = por %p115_p10, %p55_p3  ;;  %s719_s25 = sand.u32 1, %s620_s11  }
  0x15   : > { %s390_s26 = sshll.u32 %s719_s25, 3  ;;  %s404_s27 = sshll.u32 %s628_s13, 7 }
  0x16   : > { %s878_s24 = scalar_select %p712_p11, 1, 0 }
  0x17   : > { %s726_s30 = scalar_lea.hbm %s870_s0, %s404_s27  ;;  %s139_s3 = scalar_lea.vmem [#allocation2], %s390_s26 }
  0x18   : > { %s147_s4 = sshll.u32 %s139_s3, 4  ;;  %p732_p0 = pnand %p422_p13, %p695_p4  ;;  %s728_s4 = int_to_ptr.vmem [resolvable:$true] %s147_s4 }
  0x19   : > { %s136_s6 = scalar_lea.sflag [#allocation3], %s719_s25  ;;  %s486_s7 = scalar_lea.hbm %s726_s30, 128 }
  0x1a   : > { %p487_p2 = scmp.ne.s32.totalorder %s726_s30, %s486_s7  ;;  %p488_p3 = pneg %p732_p0 }
  0x1b   : > { %s491_s16 = scalar_lea.hbm %s870_s0, 256  ;;  %p492_p4 = scmp.lt.u32.totalorder %s726_s30, %s870_s0 }
  0x1c   : > { %p489_p5 = pnand %p488_p3, %p487_p2  ;;  %p493_p7 = scmp.lt.u32.totalorder %s491_s16, %s486_s7 }
  0x1d   : > { %p495_p13 = scmp.lt.u32.totalorder %s486_s7, %s726_s30 }
  0x1e   : > { %p490_p6 = pneg %p489_p5  ;;  %p494_p10 = por %p493_p7, %p492_p4 }
  0x20   : > { %p496_p12 = por %p495_p13, %p494_p10 }
  0x22   : > { %p497_p1 = pnand %p496_p12, %p490_p6 }
  0x24   : > { %500 = shalt.err (!%p497_p1)
}
  0x25   : > { %s501_s20 = scalar_lea.vmem %s728_s4, 128  ;;  %s634_s26 = smov [#allocation2]  }
  0x26   : > { %p502_p2 = scmp.ne.s32.totalorder %s728_s4, %s501_s20  ;;  %s506_s27 = sshll.u32 %s634_s26, 4  ;;  %s507_s27 = int_to_ptr.vmem [resolvable:$false] %s506_s27 }
  0x27   : > { %s508_s28 = scalar_lea.vmem %s507_s27, 256  ;;  %p509_p9 = scmp.lt.s32.totalorder %s728_s4, %s507_s27 }
  0x28   : > { %p504_p5 = pnand %p502_p2, %p488_p3  ;;  %p510_p4 = scmp.lt.s32.totalorder %s508_s28, %s501_s20 }
  0x2a   : > { %p505_p11 = pneg %p504_p5  ;;  %p511_p7 = por %p510_p4, %p509_p9 }
  0x2c   : > { %p512_p10 = pnand %p511_p7, %p505_p11 }
  0x2e   : > { %515 = shalt.err (!%p512_p10)
}
  0x2f   : > { %s635_s29 = smov 32   ;;  %s636_s3 = smov 2  }
  0x30   : > { %414 = dma.hbm_to_vmem [thread:$0]  (!%p732_p0), %s726_s30, 128, %s728_s4, %s136_s6, %s635_s29, %s635_s29, %s636_s3  }
  0x31   : > { %p174_p12 = scmp.lt.s32.totalorder %s632_s14, 3  ;;  %s393_s7 = sshll.u32 %s719_s25, 1 }
  0x32   : > { %s394_s8 = sshll.u32 %s628_s13, 5  ;;  %p880_p9 = scmp.ge.s32.totalorder %s632_s14, 1 }
  0x33   : > { %s777_s19 = scalar_lea.hbm %s871_s1, %s394_s8  ;;  %s161_s20 = scalar_lea.vmem [#allocation5], %s393_s7 }
  0x34   : > { %p770_p11 = pnand %p880_p9, %p174_p12  ;;  %s169_s26 = sshll.u32 %s161_s20, 4  ;;  %s170_s26 = int_to_ptr.vmem [resolvable:$true] %s169_s26 }
  0x35   : > { %s158_s30 = scalar_lea.sflag [#allocation6], %s719_s25  ;;  %s516_s4 = scalar_lea.hbm %s777_s19, 32 }
  0x36   : > { %s881_s15 = scalar_select %p770_p11, 1, 0 }
  0x37   : > { %p517_p1 = scmp.ne.s32.totalorder %s777_s19, %s516_s4  ;;  %s521_s28 = scalar_lea.hbm %s871_s1, 64 }
  0x38   : > { %p522_p2 = scmp.lt.u32.totalorder %s777_s19, %s871_s1  ;;  %p523_p5 = scmp.lt.u32.totalorder %s521_s28, %s516_s4 }
  0x39   : > { %p519_p6 = pnand %p517_p1, %p488_p3  ;;  %p525_p7 = scmp.lt.u32.totalorder %s516_s4, %s777_s19 }
  0x3a   : > { %p524_p4 = por %p523_p5, %p522_p2 }
  0x3b   : > { %p520_p13 = pneg %p519_p6 }
  0x3c   : > { %p526_p10 = por %p525_p7, %p524_p4 }
  0x3e   : > { %p527_p12 = pnand %p526_p10, %p520_p13 }
  0x40   : > { %530 = shalt.err (!%p527_p12)
}
  0x41   : > { %s531_s25 = scalar_lea.vmem %s170_s26, 32  ;;  %s637_s7 = smov [#allocation5]  }
  0x42   : > { %p532_p9 = scmp.ne.s32.totalorder %s170_s26, %s531_s25  ;;  %s536_s8 = sshll.u32 %s637_s7, 4  ;;  %s537_s8 = int_to_ptr.vmem [resolvable:$false] %s536_s8 }
  0x43   : > { %s538_s16 = scalar_lea.vmem %s537_s8, 64  ;;  %p539_p8 = scmp.lt.s32.totalorder %s170_s26, %s537_s8 }
  0x44   : > { %p534_p1 = pnand %p532_p9, %p488_p3  ;;  %p540_p11 = scmp.lt.s32.totalorder %s538_s16, %s531_s25 }
  0x46   : > { %p535_p6 = pneg %p534_p1  ;;  %p541_p2 = por %p540_p11, %p539_p8 }
  0x48   : > { %p542_p5 = pnand %p541_p2, %p535_p6 }
  0x4a   : > { %545 = shalt.err (!%p542_p5)
}
  0x4b   : > { %417 = dma.hbm_to_vmem [thread:$0]  (!%p732_p0), %s777_s19, 32, %s170_s26, %s158_s30  }
  0x4c   : > { %p882_p13 = scmp.ne.s32.totalorder %s881_s15, 0 }
  0x4d   : > { %s802_s18 = sand.u32 (!%p882_p13), 1, %s616_s10   ;;  %p883_p3 = scmp.ne.s32.totalorder (!%p882_p13), %s876_s21, 0 }
  0x4e   : > { %178 = sbr.rel (%p882_p13) target bundleno = 175 (0xaf), region = 28  ;;  %s396_s20 = sshll.u32 (!%p882_p13), %s802_s18, 3 }
  0x4f   : > { %s181_s4 = scalar_lea.sflag (!%p882_p13), [#allocation3], %s802_s18  ;;  %s184_s6 = scalar_lea.vmem (!%p882_p13), [#allocation2], %s396_s20 }
  0x55   : > { %599 = dma.done.wait (%p883_p3), %s181_s4, 128  }
  0x56   : > { %601 = vsyncadd (%p883_p3), %s181_s4, 4294967168  ;;  %s397_s5 = sshll.u32 %s802_s18, 1  ;;  %s190_s15 = scalar_lea.sflag [#allocation6], %s802_s18 }
  0x57   : > { %s193_s19 = scalar_lea.vmem [#allocation5], %s397_s5 }
  0x58   : > { %603 = dma.done.wait (%p883_p3), %s190_s15, 32  }
  0x59   : > { %605 = vsyncadd (%p883_p3), %s190_s15, 4294967264  ;;  %v219_v0 = vld [vmem:[%s184_s6] sm:$0x3]  ;;  %v398_v1 = vld [vmem:[%s184_s6 + $0x2] sm:$0x3]  ;;  %vm262_vm4 = vcmask 1041408  }
  0x5a   : > { %v222_v2 = vmax.f32 %v219_v0, %v398_v1  ;;  %v399_v3 = vld [vmem:[%s184_s6 + $0x4] sm:$0x3]  ;;  %v400_v4 = vld [vmem:[%s184_s6 + $0x6] sm:$0x3]  ;;  %v218_v17 = vld [vmem:[%s193_s19] sm:$0x3] }
  0x5b   : > { %vm233_vm0 = vcmp.eq.s32.totalorder %v218_v17, 0  ;;  %vm239_vm1 = vcmp.eq.s32.totalorder %v218_v17, 1  ;;  %vm245_vm2 = vcmp.eq.s32.totalorder %v218_v17, 2  ;;  %vm251_vm3 = vcmp.eq.s32.totalorder %v218_v17, 3  ;;  %s217_s21 = scalar_lea.vmem [#allocation7], %s802_s18  ;;  %s401_s30 = sshll.u32 %s624_s12, 4 }
  0x5c   : > { %v225_v5 = vmax.f32 %v222_v2, %v399_v3  ;;  %s285_s26 = sshll.u32 %s217_s21, 4  ;;  %s823_s29 = scalar_lea.hbm %s872_s2, %s401_s30  ;;  %s818_s26 = int_to_ptr.vmem [resolvable:$true] %s285_s26 }
  0x5d   : > { %s272_s3 = scalar_lea.sflag [#allocation4], %s802_s18  ;;  %s546_s25 = scalar_lea.vmem %s818_s26, 16 }
  0x5e   : > { %v228_v6 = vmax.f32 %v225_v5, %v400_v4  ;;  %p547_p8 = scmp.ne.s32.totalorder %s818_s26, %s546_s25  ;;  %p884_p0 = scmp.ne.s32.totalorder %s877_s22, 0 }
  0x5f   : > { %s638_s12 = smov [#allocation7]  }
  0x60   : > { %v229_v7 = vsub.f32 %v219_v0, %v228_v6  ;;  %v235_v8 = vsub.f32 %v398_v1, %v228_v6  ;;  %v241_v9 = vsub.f32 %v399_v3, %v228_v6  ;;  %v247_v10 = vsub.f32 %v400_v4, %v228_v6  ;;  %p548_p11 = pnand %p547_p8, %p884_p0  ;;  %s550_s7 = sshll.u32 %s638_s12, 4  ;;  %s551_s7 = int_to_ptr.vmem [resolvable:$false] %s550_s7 }
  0x61   : > { %s552_s8 = scalar_lea.vmem %s551_s7, 32  ;;  %p553_p7 = scmp.lt.s32.totalorder %s818_s26, %s551_s7 }
  0x62   : > { %v230_v11 = vmul.f32 1.442695, %v229_v7  ;;  %v236_v12 = vmul.f32 1.442695, %v235_v8  ;;  %v242_v13 = vmul.f32 1.442695, %v241_v9  ;;  %p549_p4 = pneg %p548_p11  ;;  %p554_p10 = scmp.lt.s32.totalorder %s552_s8, %s546_s25 }
  0x63   : > { %v248_v14 = vmul.f32 1.442695, %v247_v10 }
  0x64   : > { %474 = vpow2.f32 %v230_v11  ;;  %p555_p12 = por %p554_p10, %p553_p7 }
  0x65   : > { %476 = vpow2.f32 %v236_v12 }
  0x66   : > { %478 = vpow2.f32 %v242_v13  ;;  %p556_p9 = pnand %p555_p12, %p549_p4 }
  0x67   : > { %480 = vpow2.f32 %v248_v14 }
  0x6e   : > { %v475_v15 = vpop.eup %474 }
  0x6f   : > { %v477_v16 = vpop.eup %476  ;;  %v234_v23 = vsel %vm233_vm0, %v475_v15, 0.0 }
  0x70   : > { %v479_v18 = vpop.eup %478  ;;  %v238_v19 = vadd.f32 %v477_v16, %v475_v15  ;;  %v240_v24 = vsel %vm239_vm1, %v477_v16, %v234_v23 }
  0x71   : > { %v481_v20 = vpop.eup %480  ;;  %v246_v25 = vsel %vm245_vm2, %v479_v18, %v240_v24 }
  0x72   : > { %v244_v21 = vadd.f32 %v479_v18, %v238_v19  ;;  %v252_v26 = vsel %vm251_vm3, %v481_v20, %v246_v25 }
  0x74   : > { %v250_v22 = vadd.f32 %v481_v20, %v244_v21 }
  0x76   : > { %482 = vrcp.f32 %v250_v22 }
  0x80   : > { %v483_v27 = vpop.eup %482 }
  0x81   : > { %v254_v28 = vmul.f32 %v483_v27, %v252_v26 }
  0x83   : > { %v255_v29 = vadd.f32 1e-10, %v254_v28 }
  0x85   : > { %484 = vlog2.f32 %v255_v29  ;;  %v258_v30 = vsub.f32 1.0, %v255_v29 }
  0x87   : > { %v259_v31 = vmul.f32 %v258_v30, %v258_v30 }
  0x89   : > { %v260_v32 = vsub.f32 0.0, %v259_v31 }
  0x8f   : > { %v485_v33 = vpop.eup %484 }
  0x90   : > { %v257_v34 = vmul.f32 0.6931472, %v485_v33 }
  0x92   : > { %v261_v35 = vmul.f32 %v260_v32, %v257_v34 }
  0x94   : > { %v263_v36 = vsel %vm262_vm4, %v261_v35, 0.0 }
  0x95   : > { %v264_v37 = vrot.slane %v263_v36, 4 }
  0x97   : > { %v265_v38 = vadd.f32 %v264_v37, %v263_v36 }
  0x99   : > { %v266_v39 = vrot.slane %v265_v38, 2 }
  0x9b   : > { %v267_v40 = vadd.f32 %v266_v39, %v265_v38 }
  0x9d   : > { %v268_v41 = vrot.slane %v267_v40, 1 }
  0x9f   : > { %v269_v42 = vadd.f32 %v268_v41, %v267_v40 }
  0xa1   : > { %270 = vst [vmem:[%s217_s21] sm:$0x1] %v269_v42 }
  0xa2   : > { %559 = shalt.err (!%p556_p9)
}
  0xa3   : > { %s560_s16 = scalar_lea.hbm %s823_s29, 16  ;;  %s564_s4 = scalar_lea.hbm %s872_s2, 32 }
  0xa4   : > { %p561_p1 = scmp.ne.s32.totalorder %s823_s29, %s560_s16  ;;  %p565_p5 = scmp.lt.u32.totalorder %s823_s29, %s872_s2 }
  0xa5   : > { %p566_p13 = scmp.lt.u32.totalorder %s564_s4, %s560_s16  ;;  %p568_p8 = scmp.lt.u32.totalorder %s560_s16, %s823_s29 }
  0xa6   : > { %p562_p6 = pnand %p561_p1, %p884_p0 }
  0xa7   : > { %p567_p3 = por %p566_p13, %p565_p5 }
  0xa8   : > { %p563_p2 = pneg %p562_p6 }
  0xa9   : > { %p569_p11 = por %p568_p8, %p567_p3 }
  0xab   : > { %p570_p4 = pnand %p569_p11, %p563_p2 }
  0xad   : > { %573 = shalt.err (!%p570_p4)
}
  0xae   : > { %409 = dma.vmem_to_hbm [thread:$0]  (%p884_p0), %s818_s26, 16, %s823_s29, %s272_s3  }
  0xaf PF: > { %s297_s15 = sand.u32 1, %s612_s9   ;;  %p885_p7 = scmp.ne.s32.totalorder %s878_s24, 0 }
  0xb0   : > { %p886_p10 = scmp.ge.s32.totalorder %s632_s14, 2  ;;  %s298_s19 = scalar_lea.sflag [#allocation4], %s297_s15 }
  0xb2   : > { %p419_p12 = pnand %p886_p10, %p885_p7 }
  0xb4   : > { %607 = dma.done.wait (!%p419_p12), %s298_s19, 16  }
  0xb5   : > { %609 = vsyncadd (!%p419_p12), %s298_s19, 4294967280  ;;  %s21_s14 = sadd.s32 1, %s632_s14   ;;  %s887_s9 = smov %s616_s10 }
  0xb6   : > { %p18_p9 = scmp.ge.s32.totalorder %s21_s14, 4   ;;  %s888_s10 = smov %s620_s11 }
  0xb7   : > { %s889_s11 = smov %s710_s23  ;;  %s890_s12 = smov %s628_s13 }
  0xb8   : > { %s891_s13 = smov %s893_s17  ;;  %20 = sbr.rel (!%p18_p9) target bundleno = 8 (0x8), region = 89 }
  0xbf   :  { %302 = vsyncpa [#allocation3], 1 }
  0xc0   :  { %304 = vsyncpa [#allocation3 + $0x1], 1 }
  0xc1   :  { %305 = vsyncpa [#allocation6], 1 }
  0xc2   :  { %307 = vsyncpa [#allocation6 + $0x1], 1 }
  0xc3   :  { %308 = vsyncpa [#allocation4], 1 }
  0xc4   :  { %310 = vsyncpa [#allocation4 + $0x1], 1 }

</bundles_post_ra>
